<compile_context>
chip_gen: v7x
topology: tpu7x:2x2x1
jax: 0.10.0
libtpu: 0.0.40
codegen_flags: <defaults>
</compile_context>

<pallas_src>
import functools

import jax
import jax.numpy as jnp
from jax.experimental import pallas as pl
from jax.experimental.pallas import tpu as pltpu


def _round_up(x, m):
    return (x + m - 1) // m * m


def _cdiv(a, b):
    return -(-a // b)


# --------------------------------------------------------------------------- kernel


def _actor_kernel(max_action,
                  s_ref,
                  w1_ref, b1_ref,
                  w2_ref, b2_ref,
                  w3_ref, b3_ref,
                  w4_ref, b4_ref,
                  out_ref):
    """Fused 4-layer MLP: 3x (bf16 matmul + f32 bias + relu -> bf16), then matmul + bias
    + tanh * max_action."""

    def hidden_layer(x_bf16, w_ref, b_ref):
        # bf16 MXU matmul with f32 accumulation; bias + ReLU in f32; the result is
        # materialized directly as the bf16 activation of the next layer so only a
        # single intermediate per layer needs to be stored (v5e has one vst slot).
        h = jnp.dot(x_bf16, w_ref[...], preferred_element_type=jnp.float32) + b_ref[...]
        return jnp.maximum(h, 0.0).astype(jnp.bfloat16)

    a = hidden_layer(s_ref[...], w1_ref, b1_ref)
    a = hidden_layer(a, w2_ref, b2_ref)
    a = hidden_layer(a, w3_ref, b3_ref)
    h = jnp.dot(a, w4_ref[...], preferred_element_type=jnp.float32) + b4_ref[...]
    out_ref[...] = (jnp.tanh(h) * max_action).astype(out_ref.dtype)


# ----------------------------------------------------------------- one-time prep


def prepare_actor_params(params):
    """Pad + cast the Actor weights ONCE (hoisted out of the per-forward path).

    params: dict of w{i}: [in, out] f32 (transpose of torch's [out, in]) and
            b{i}: [1, out] f32.
    Returns (prepared, dims): bf16 weights padded to (16-aligned K, 128-aligned N),
    f32 biases padded to 128-aligned N, plus the logical/padded dims.

    Zero padding is exact: padded units have 0 weight + 0 bias, ReLU keeps them 0, and
    padded output lanes are sliced off in the wrapper.
    """
    state_dim, hidden = params["w1"].shape
    action_dim = params["w4"].shape[1]
    SD_P = _round_up(state_dim, 16)     # bf16 packs 2 rows/sublane -> 16-aligned K for l1
    H_P = _round_up(hidden, 128)        # lane/K-aligned hidden width (100 -> 128)
    AD_P = _round_up(action_dim, 128)   # lane-dense output (4 -> 128), sliced after

    def pad2(x, rows, cols, dtype):
        x = x.astype(dtype)
        return jnp.pad(x, ((0, rows - x.shape[0]), (0, cols - x.shape[1])))

    prepared = dict(
        w1=pad2(params["w1"], SD_P, H_P, jnp.bfloat16),
        w2=pad2(params["w2"], H_P, H_P, jnp.bfloat16),
        w3=pad2(params["w3"], H_P, H_P, jnp.bfloat16),
        w4=pad2(params["w4"], H_P, AD_P, jnp.bfloat16),
        b1=pad2(params["b1"], 1, H_P, jnp.float32),
        b2=pad2(params["b2"], 1, H_P, jnp.float32),
        b3=pad2(params["b3"], 1, H_P, jnp.float32),
        b4=pad2(params["b4"], 1, AD_P, jnp.float32),
    )
    dims = dict(state_dim=state_dim, hidden=hidden, action_dim=action_dim,
                SD_P=SD_P, H_P=H_P, AD_P=AD_P)
    return prepared, dims


# ------------------------------------------------------------------ tiling helpers


def _choose_batch_tiling(B, *, max_tile=4096, min_steps=2):
    """Pick (tile_rows, n_steps) so that:
      - the grid has an even number of steps (>= min_steps) so v7x's 2 TensorCores split
        the 'parallel' batch axis evenly,
      - tile_rows <= max_tile (keeps double-buffered tiles well inside 64 MiB VMEM and
        amortizes the ~0.35 us per-grid-step overhead on v6e/v5e),
      - tile_rows is a multiple of 16 (bf16 sublane pack),
      - batch-padding waste is bounded by one 16-row group (TB derived from ceil(B/steps)
        rather than a fixed 2048)."""
    n_steps = max(min_steps, _cdiv(B, max_tile))
    if n_steps > 1 and n_steps % 2 == 1:
        n_steps += 1
    tb = min(max_tile, _round_up(_cdiv(B, n_steps), 16))
    return tb, n_steps


def _vmem_limit_bytes(tb, sd_p, h_p, ad_p, out_itemsize):
    """Size the VMEM request from the actual footprint (+margin) instead of a magic 48 MiB."""
    io = 2 * tb * sd_p * 2 + 2 * tb * ad_p * out_itemsize              # double-buffered in/out
    weights = 2 * ((sd_p * h_p + 2 * h_p * h_p + h_p * ad_p) * 2       # bf16 weights (x2 bufs)
                   + (3 * h_p + ad_p) * 4)                             # f32 biases  (x2 bufs)
    acts = 3 * tb * h_p * (4 + 2)                                      # live f32+bf16 activations
    total = io + weights + acts
    return min(max(8 << 20, int(1.5 * total) + (2 << 20)), 64 << 20)


# ------------------------------------------------------------------------ forward


def actor_forward(state, prepared, dims, max_action, *,
                  max_batch_tile=4096, out_dtype=jnp.float32):
    """state: [B, state_dim] f32. prepared/dims: from prepare_actor_params."""
    B, state_dim = state.shape
    assert state_dim == dims["state_dim"]
    SD_P, H_P, AD_P = dims["SD_P"], dims["H_P"], dims["AD_P"]
    action_dim = dims["action_dim"]

    TB, n_steps = _choose_batch_tiling(B, max_tile=max_batch_tile)
    B_P = TB * n_steps

    # Only the state is padded/cast per call; weights were prepared once at init.
    s_p = jnp.pad(state.astype(jnp.bfloat16), ((0, B_P - B), (0, SD_P - state_dim)))

    tiled = lambda i: (i, 0)       # state / output: walk the batch
    resident = lambda i: (0, 0)    # weights / biases: same block every step -> DMA'd once

    out_itemsize = jnp.dtype(out_dtype).itemsize
    weight_bytes = sum(int(v.size) * v.dtype.itemsize for v in prepared.values())
    cost = pl.CostEstimate(
        flops=int(2 * B_P * (SD_P * H_P + 2 * H_P * H_P + H_P * AD_P)),
        transcendentals=int(B_P * AD_P),
        bytes_accessed=int(s_p.size) * 2 + weight_bytes + int(B_P * AD_P) * out_itemsize,
    )

    out_padded = pl.pallas_call(
        functools.partial(_actor_kernel, float(max_action)),
        out_shape=jax.ShapeDtypeStruct((B_P, AD_P), out_dtype),
        grid=(n_steps,),
        in_specs=[
            pl.BlockSpec((TB, SD_P), tiled),      # state tile
            pl.BlockSpec((SD_P, H_P), resident),  # w1
            pl.BlockSpec((1, H_P), resident),     # b1
            pl.BlockSpec((H_P, H_P), resident),   # w2
            pl.BlockSpec((1, H_P), resident),     # b2
            pl.BlockSpec((H_P, H_P), resident),   # w3
            pl.BlockSpec((1, H_P), resident),     # b3
            pl.BlockSpec((H_P, AD_P), resident),  # w4
            pl.BlockSpec((1, AD_P), resident),    # b4
        ],
        out_specs=pl.BlockSpec((TB, AD_P), tiled),
        compiler_params=pltpu.CompilerParams(
            dimension_semantics=("parallel",),    # shard batch tiles across TCs (v7x)
            vmem_limit_bytes=_vmem_limit_bytes(TB, SD_P, H_P, AD_P, out_itemsize),
        ),
        cost_estimate=cost,
    )(s_p,
      prepared["w1"], prepared["b1"],
      prepared["w2"], prepared["b2"],
      prepared["w3"], prepared["b3"],
      prepared["w4"], prepared["b4"])

    return out_padded[:B, :action_dim].astype(jnp.float32)


# --------------------------------------------------------------------- init / refs


def init_actor_params(key, state_dim, action_dim, layer_height=100):
    """PyTorch-style init: U(-1/sqrt(fan_in), 1/sqrt(fan_in)).

    Weights stored as [in_features, out_features] (transpose of torch's [out, in]) so
    the kernel can do x @ W directly. Biases are [1, out_features].
    """
    dims = [(state_dim, layer_height),
            (layer_height, layer_height),
            (layer_height, layer_height),
            (layer_height, action_dim)]
    params = {}
    for i, (fan_in, fan_out) in enumerate(dims, start=1):
        key, kw, kb = jax.random.split(key, 3)
        bound = 1.0 / jnp.sqrt(float(fan_in))
        params[f"w{i}"] = jax.random.uniform(
            kw, (fan_in, fan_out), jnp.float32, minval=-bound, maxval=bound)
        params[f"b{i}"] = jax.random.uniform(
            kb, (1, fan_out), jnp.float32, minval=-bound, maxval=bound)
    return params


def actor_forward_ref_f32(state, params, max_action):
    """Pure-JAX f32 reference (matches the PyTorch module's math)."""
    h = jnp.maximum(state @ params["w1"] + params["b1"], 0.0)
    h = jnp.maximum(h @ params["w2"] + params["b2"], 0.0)
    h = jnp.maximum(h @ params["w3"] + params["b3"], 0.0)
    return jnp.tanh(h @ params["w4"] + params["b4"]) * max_action


def actor_forward_ref_bf16(state, params, max_action):
    """Pure-JAX reference with the same bf16-input / f32-accumulate recipe as the kernel."""
    def dot(a, w):
        return jnp.dot(a.astype(jnp.bfloat16), w.astype(jnp.bfloat16),
                       preferred_element_type=jnp.float32)
    h = jnp.maximum(dot(state, params["w1"]) + params["b1"], 0.0)
    h = jnp.maximum(dot(h, params["w2"]) + params["b2"], 0.0)
    h = jnp.maximum(dot(h, params["w3"]) + params["b3"], 0.0)
    return jnp.tanh(dot(h, params["w4"]) + params["b4"]) * max_action


if __name__ == "__main__":
    # Small shapes consistent with the module.
    batch = 2
    state_dim = 16
    action_dim = 4
    layer_height = 100
    max_action = 1.0

    key = jax.random.PRNGKey(0)
    key, k_state = jax.random.split(key)
    state = jax.random.normal(k_state, (batch, state_dim), jnp.float32)
    params = init_actor_params(key, state_dim, action_dim, layer_height)

    # Padding / bf16 cast of the weights happens ONCE here, not per forward call.
    prepared, dims = prepare_actor_params(params)

    out = jax.block_until_ready(actor_forward(state, prepared, dims, max_action))
    assert out.shape == (batch, action_dim)

    ref_bf16 = actor_forward_ref_bf16(state, params, max_action)
    ref_f32 = actor_forward_ref_f32(state, params, max_action)
    assert jnp.allclose(out, ref_bf16, atol=1e-3, rtol=1e-3), "mismatch vs bf16 reference"
    assert jnp.allclose(out, ref_f32, atol=5e-2, rtol=5e-2), "mismatch vs f32 reference"

    print("KERNEL_OK")
</pallas_src>

<mosaic_0001>
module attributes {stable_mosaic.version = 11 : i64} {
  func.func @_actor_kernel(%arg0: i32, %arg1: memref<16x16xbf16, #tpu.memory_space<vmem>>, %arg2: memref<16x128xbf16, #tpu.memory_space<vmem>>, %arg3: memref<1x128xf32, #tpu.memory_space<vmem>>, %arg4: memref<128x128xbf16, #tpu.memory_space<vmem>>, %arg5: memref<1x128xf32, #tpu.memory_space<vmem>>, %arg6: memref<128x128xbf16, #tpu.memory_space<vmem>>, %arg7: memref<1x128xf32, #tpu.memory_space<vmem>>, %arg8: memref<128x128xbf16, #tpu.memory_space<vmem>>, %arg9: memref<1x128xf32, #tpu.memory_space<vmem>>, %arg10: memref<16x128xf32, #tpu.memory_space<vmem>>) attributes {dimension_semantics = [#tpu.dimension_semantics<parallel>], iteration_bounds = array<i64: 2>, scalar_prefetch = 0 : i64, scratch_operands = 0 : i64, tpu.core_type = #tpu.core_type<tc>, window_params = [{transform_indices = @transform_0, window_bounds = array<i64: 16, 16>}, {pipeline_mode = #tpu.pipeline_mode<synchronous>, transform_indices = @transform_1, window_bounds = array<i64: 16, 128>}, {pipeline_mode = #tpu.pipeline_mode<synchronous>, transform_indices = @transform_2, window_bounds = array<i64: 1, 128>}, {pipeline_mode = #tpu.pipeline_mode<synchronous>, transform_indices = @transform_3, window_bounds = array<i64: 128, 128>}, {pipeline_mode = #tpu.pipeline_mode<synchronous>, transform_indices = @transform_4, window_bounds = array<i64: 1, 128>}, {pipeline_mode = #tpu.pipeline_mode<synchronous>, transform_indices = @transform_5, window_bounds = array<i64: 128, 128>}, {pipeline_mode = #tpu.pipeline_mode<synchronous>, transform_indices = @transform_6, window_bounds = array<i64: 1, 128>}, {pipeline_mode = #tpu.pipeline_mode<synchronous>, transform_indices = @transform_7, window_bounds = array<i64: 128, 128>}, {pipeline_mode = #tpu.pipeline_mode<synchronous>, transform_indices = @transform_8, window_bounds = array<i64: 1, 128>}, {transform_indices = @transform_9, window_bounds = array<i64: 16, 128>}]} {
    %c0 = arith.constant 0 : index
    %c0_0 = arith.constant 0 : index
    %0 = vector.load %arg1[%c0, %c0_0] : memref<16x16xbf16, #tpu.memory_space<vmem>>, vector<16x16xbf16>
    %c0_1 = arith.constant 0 : index
    %c0_2 = arith.constant 0 : index
    %1 = vector.load %arg2[%c0_1, %c0_2] : memref<16x128xbf16, #tpu.memory_space<vmem>>, vector<16x128xbf16>
    %cst = arith.constant dense<0.000000e+00> : vector<16x128xf32>
    %2 = tpu.matmul %0, %1, %cst {dimension_numbers = #tpu.dot_dimension_numbers<[1], [0], [0], [1], [0, 0, 1, 1], [], []>} : vector<16x16xbf16>, vector<16x128xbf16>, vector<16x128xf32> -> vector<16x128xf32>
    %c0_3 = arith.constant 0 : index
    %c0_4 = arith.constant 0 : index
    %3 = vector.load %arg3[%c0_3, %c0_4] : memref<1x128xf32, #tpu.memory_space<vmem>>, vector<1x128xf32>
    %4 = vector.broadcast %3 : vector<1x128xf32> to vector<16x128xf32>
    %5 = arith.addf %2, %4 : vector<16x128xf32>
    %cst_5 = arith.constant 0.000000e+00 : f32
    %6 = vector.broadcast %cst_5 : f32 to vector<16x128xf32>
    %7 = arith.maximumf %5, %6 : vector<16x128xf32>
    %8 = arith.truncf %7 : vector<16x128xf32> to vector<16x128xbf16>
    %c0_6 = arith.constant 0 : index
    %c0_7 = arith.constant 0 : index
    %9 = vector.load %arg4[%c0_6, %c0_7] : memref<128x128xbf16, #tpu.memory_space<vmem>>, vector<128x128xbf16>
    %cst_8 = arith.constant dense<0.000000e+00> : vector<16x128xf32>
    %10 = tpu.matmul %8, %9, %cst_8 {dimension_numbers = #tpu.dot_dimension_numbers<[1], [0], [0], [1], [0, 0, 1, 1], [], []>} : vector<16x128xbf16>, vector<128x128xbf16>, vector<16x128xf32> -> vector<16x128xf32>
    %c0_9 = arith.constant 0 : index
    %c0_10 = arith.constant 0 : index
    %11 = vector.load %arg5[%c0_9, %c0_10] : memref<1x128xf32, #tpu.memory_space<vmem>>, vector<1x128xf32>
    %12 = vector.broadcast %11 : vector<1x128xf32> to vector<16x128xf32>
    %13 = arith.addf %10, %12 : vector<16x128xf32>
    %cst_11 = arith.constant 0.000000e+00 : f32
    %14 = vector.broadcast %cst_11 : f32 to vector<16x128xf32>
    %15 = arith.maximumf %13, %14 : vector<16x128xf32>
    %16 = arith.truncf %15 : vector<16x128xf32> to vector<16x128xbf16>
    %c0_12 = arith.constant 0 : index
    %c0_13 = arith.constant 0 : index
    %17 = vector.load %arg6[%c0_12, %c0_13] : memref<128x128xbf16, #tpu.memory_space<vmem>>, vector<128x128xbf16>
    %cst_14 = arith.constant dense<0.000000e+00> : vector<16x128xf32>
    %18 = tpu.matmul %16, %17, %cst_14 {dimension_numbers = #tpu.dot_dimension_numbers<[1], [0], [0], [1], [0, 0, 1, 1], [], []>} : vector<16x128xbf16>, vector<128x128xbf16>, vector<16x128xf32> -> vector<16x128xf32>
    %c0_15 = arith.constant 0 : index
    %c0_16 = arith.constant 0 : index
    %19 = vector.load %arg7[%c0_15, %c0_16] : memref<1x128xf32, #tpu.memory_space<vmem>>, vector<1x128xf32>
    %20 = vector.broadcast %19 : vector<1x128xf32> to vector<16x128xf32>
    %21 = arith.addf %18, %20 : vector<16x128xf32>
    %cst_17 = arith.constant 0.000000e+00 : f32
    %22 = vector.broadcast %cst_17 : f32 to vector<16x128xf32>
    %23 = arith.maximumf %21, %22 : vector<16x128xf32>
    %24 = arith.truncf %23 : vector<16x128xf32> to vector<16x128xbf16>
    %c0_18 = arith.constant 0 : index
    %c0_19 = arith.constant 0 : index
    %25 = vector.load %arg8[%c0_18, %c0_19] : memref<128x128xbf16, #tpu.memory_space<vmem>>, vector<128x128xbf16>
    %cst_20 = arith.constant dense<0.000000e+00> : vector<16x128xf32>
    %26 = tpu.matmul %24, %25, %cst_20 {dimension_numbers = #tpu.dot_dimension_numbers<[1], [0], [0], [1], [0, 0, 1, 1], [], []>} : vector<16x128xbf16>, vector<128x128xbf16>, vector<16x128xf32> -> vector<16x128xf32>
    %c0_21 = arith.constant 0 : index
    %c0_22 = arith.constant 0 : index
    %27 = vector.load %arg9[%c0_21, %c0_22] : memref<1x128xf32, #tpu.memory_space<vmem>>, vector<1x128xf32>
    %28 = vector.broadcast %27 : vector<1x128xf32> to vector<16x128xf32>
    %29 = arith.addf %26, %28 : vector<16x128xf32>
    %30 = math.tanh %29 : vector<16x128xf32>
    %cst_23 = arith.constant 1.000000e+00 : f32
    %31 = vector.broadcast %cst_23 : f32 to vector<16x128xf32>
    %32 = arith.mulf %30, %31 : vector<16x128xf32>
    %c0_24 = arith.constant 0 : index
    %c0_25 = arith.constant 0 : index
    %33 = vector.load %arg10[%c0_24, %c0_25] : memref<16x128xf32, #tpu.memory_space<vmem>>, vector<16x128xf32>
    tpu.vector_store %arg10[%c0_24, %c0_25], %32 {strides = array<i32>} : memref<16x128xf32, #tpu.memory_space<vmem>>, vector<16x128xf32>,
    return
  }
  func.func @transform_0(%arg0: i32) -> (i32, i32) {
    %c0_i32 = arith.constant 0 : i32
    %c0_i32_0 = arith.constant 0 : i32
    return %arg0, %c0_i32 : i32, i32
  }
  func.func @transform_1(%arg0: i32) -> (i32, i32) {
    %c0_i32 = arith.constant 0 : i32
    %c0_i32_0 = arith.constant 0 : i32
    %c0_i32_1 = arith.constant 0 : i32
    return %c0_i32, %c0_i32_0 : i32, i32
  }
  func.func @transform_2(%arg0: i32) -> (i32, i32) {
    %c0_i32 = arith.constant 0 : i32
    %c0_i32_0 = arith.constant 0 : i32
    %c0_i32_1 = arith.constant 0 : i32
    return %c0_i32, %c0_i32_0 : i32, i32
  }
  func.func @transform_3(%arg0: i32) -> (i32, i32) {
    %c0_i32 = arith.constant 0 : i32
    %c0_i32_0 = arith.constant 0 : i32
    %c0_i32_1 = arith.constant 0 : i32
    return %c0_i32, %c0_i32_0 : i32, i32
  }
  func.func @transform_4(%arg0: i32) -> (i32, i32) {
    %c0_i32 = arith.constant 0 : i32
    %c0_i32_0 = arith.constant 0 : i32
    %c0_i32_1 = arith.constant 0 : i32
    return %c0_i32, %c0_i32_0 : i32, i32
  }
  func.func @transform_5(%arg0: i32) -> (i32, i32) {
    %c0_i32 = arith.constant 0 : i32
    %c0_i32_0 = arith.constant 0 : i32
    %c0_i32_1 = arith.constant 0 : i32
    return %c0_i32, %c0_i32_0 : i32, i32
  }
  func.func @transform_6(%arg0: i32) -> (i32, i32) {
    %c0_i32 = arith.constant 0 : i32
    %c0_i32_0 = arith.constant 0 : i32
    %c0_i32_1 = arith.constant 0 : i32
    return %c0_i32, %c0_i32_0 : i32, i32
  }
  func.func @transform_7(%arg0: i32) -> (i32, i32) {
    %c0_i32 = arith.constant 0 : i32
    %c0_i32_0 = arith.constant 0 : i32
    %c0_i32_1 = arith.constant 0 : i32
    return %c0_i32, %c0_i32_0 : i32, i32
  }
  func.func @transform_8(%arg0: i32) -> (i32, i32) {
    %c0_i32 = arith.constant 0 : i32
    %c0_i32_0 = arith.constant 0 : i32
    %c0_i32_1 = arith.constant 0 : i32
    return %c0_i32, %c0_i32_0 : i32, i32
  }
  func.func @transform_9(%arg0: i32) -> (i32, i32) {
    %c0_i32 = arith.constant 0 : i32
    %c0_i32_0 = arith.constant 0 : i32
    return %arg0, %c0_i32 : i32, i32
  }
}

</mosaic_0001>

<bundles_post_ra>
// kernel: tpu_custom_call.1
= control target key start
LH: loop header
LB: loop body
LE: loop exit
PB: predicated region body
PF: predicated region fallthrough
CT: control target
= control target key end

     0   :  { %14 = vsyncpa [#allocation3], 0  ;;  %s1628_s0 = inlined_call_operand.vmem [shape: bf16[32,16], index: 0, kind: input, shape index: {}]   ;;  %s1629_s1 = inlined_call_operand.vmem [shape: bf16[16,128], index: 1, kind: input, shape index: {}]   ;;  %s1630_s2 = inlined_call_operand.vmem [shape: f32[1,128], index: 2, kind: input, shape index: {}]   ;;  %s1631_s3 = inlined_call_operand.hbm [shape: bf16[128,128], index: 3, kind: input, shape index: {}]   ;;  %s1632_s4 = inlined_call_operand.vmem [shape: f32[1,128], index: 4, kind: input, shape index: {}]   ;;  %s1633_s5 = inlined_call_operand.hbm [shape: bf16[128,128], index: 5, kind: input, shape index: {}]   ;;  %s1634_s6 = inlined_call_operand.vmem [shape: f32[1,128], index: 6, kind: input, shape index: {}]   ;;  %s1635_s7 = inlined_call_operand.hbm [shape: bf16[128,128], index: 7, kind: input, shape index: {}]   ;;  %s1636_s8 = inlined_call_operand.vmem [shape: f32[1,128], index: 8, kind: input, shape index: {}]   ;;  %s1637_s9 = inlined_call_operand.hbm [shape: f32[32,128], index: 9, kind: output, shape index: {}]  }
   0x1   :  { %15 = vsyncpa [#allocation6], 0 }
   0x2   :  { %16 = vsyncpa [#allocation4], 0 }
   0x3   :  { %18 = vsyncpa [#allocation4 + $0x1], 0  ;;  %s1369_s30 = smov 0   ;;  %s1371_s10 = smov 0  }
   0x4   :  { %s1373_s11 = smov 0   ;;  %s1375_s12 = smov 0  }
   0x5 LB: > { %1646 = sst [smem:[#allocation12_spill]] %s1295_s30  ;;  %s1390_s13 = sadd.s32 4294967295, %s1307_s12   ;;  %s1307_s12 = sphi %s1375_s12, %s1665_s12   ;;  %s1303_s11 = sphi %s1373_s11, %s1667_s11   ;;  %s1299_s10 = sphi %s1371_s10, %s1669_s10   ;;  %s1295_s30 = sphi %s1369_s30, %s1668_s30  }
   0x6   : > { %1647 = sst [smem:[#allocation13_spill]] %s1303_s11  ;;  %s902_s14 = sadd.s32 4294967294, %s1307_s12  }
   0x7   : > { %s1394_s15 = sadd.s32 1, %s1307_s12   ;;  %s225_s16 = sadd.s32 1, %s1303_s11 }
   0x8   : > { %1648 = sst [smem:[#allocation14_spill]] %s1394_s15  ;;  %s222_s17 = ssub.s32 %s1307_s12, %s1394_s15 }
   0x9   : > { %p235_p0 = scmp.ne.s32.totalorder %s1303_s11, %s1299_s10  ;;  %p223_p1 = scmp.eq.s32.totalorder %s222_s17, 0 }
   0xa   : > { %p236_p2 = scmp.eq.s32.totalorder %s1390_s13, 1  ;;  %p241_p3 = scmp.ne.s32.totalorder %s1299_s10, %s1295_s30 }
   0xb   : > { %p242_p4 = scmp.eq.s32.totalorder %s902_s14, 1  ;;  %p903_p7 = scmp.ge.s32.totalorder %s1307_s12, 1 }
   0xc   : > { %s1405_s18 = scalar_select %p223_p1, %s1303_s11, %s225_s16  }
   0xd   : > { %p1407_p5 = por %p236_p2, %p235_p0  ;;  %p1411_p6 = por %p242_p4, %p241_p3 }
   0xe   : > { %1649 = sst [smem:[#allocation15_spill]] %s1405_s18  ;;  %p249_p8 = scmp.lt.s32.totalorder %s1307_s12, 3 }
   0xf   : > { %s1650_s19 = scalar_select %p1407_p5, 1, 0 }
  0x10   : > { %s1651_s20 = scalar_select %p1411_p6, 1, 0 }
  0x11   : > { %p1638_p9 = scmp.eq.s32.totalorder %s1390_s13, 0  ;;  %p1418_p10 = pnand %p903_p7, %p249_p8 }
  0x12   : > { %1652 = sst [smem:[#allocation16_spill]] %s1651_s20  ;;  %s1309_s22 = smov [#allocation5]  }
  0x13   : > { %s1653_s21 = scalar_select %p1418_p10, 1, 0 }
  0x14   : > { %p1061_p11 = pneg %p1418_p10  ;;  %s283_s23 = sshll.u32 %s1309_s22, 4  ;;  %s1424_s23 = int_to_ptr.vmem [resolvable:$true] %s283_s23 }
  0x15   : > { %s1310_s25 = smov [#allocation2]   ;;  %s1311_s27 = smov [#allocation7]  }
  0x16   : > { %p1428_p12 = pnand %p1638_p9, %p1061_p11  ;;  %s267_s26 = sshll.u32 %s1310_s25, 4  ;;  %s1432_s26 = int_to_ptr.vmem [resolvable:$true] %s267_s26 }
  0x17   : > { %s1434_s28 = sshll.u32 %s1311_s27, 4  ;;  %s1153_s16 = scalar_lea.hbm %s1633_s5, 1024  ;;  %s300_s28 = int_to_ptr.vmem [resolvable:$true] %s1434_s28 }
  0x18   : > { %p1154_p13 = scmp.ne.s32.totalorder %s1633_s5, %s1153_s16  ;;  %p1444_p0 = pneg %p1428_p12 }
  0x19   : > { %p1160_p3 = scmp.lt.u32.totalorder %s1153_s16, %s1633_s5 }
  0x1a   : > { %p1156_p1 = pnand %p1444_p0, %p1154_p13 }
  0x1c   : > { %p1157_p2 = pneg %p1156_p1 }
  0x1e   : > { %p1162_p4 = pnand %p1160_p3, %p1157_p2 }
  0x20   : > { %1165 = shalt.err (!%p1162_p4)
}
  0x21   : > { %s1166_s29 = scalar_lea.vmem %s1424_s23, 1024  ;;  %p1174_p9 = scmp.lt.s32.totalorder %s1424_s23, %s1424_s23 }
  0x22   : > { %p1167_p7 = scmp.ne.s32.totalorder %s1424_s23, %s1166_s29  ;;  %p1175_p6 = scmp.lt.s32.totalorder %s1166_s29, %s1166_s29 }
  0x24   : > { %p1169_p8 = pnand %p1167_p7, %p1444_p0  ;;  %p1176_p13 = por %p1175_p6, %p1174_p9 }
  0x26   : > { %p1170_p11 = pneg %p1169_p8 }
  0x28   : > { %p1177_p1 = pnand %p1176_p13, %p1170_p11 }
  0x2a   : > { %1180 = shalt.err (!%p1177_p1)
}
  0x2b   : > { %s1312_s14 = smov 64   ;;  %s1313_s16 = smov 4  }
  0x2c   : > { %1067 = dma.hbm_to_vmem [thread:$0]  (!%p1428_p12), %s1633_s5, 1024, %s1424_s23, [#allocation6], %s1312_s14, %s1312_s14, %s1313_s16  }
  0x2d   : > { %s1181_s29 = scalar_lea.hbm %s1631_s3, 1024 }
  0x2e   : > { %p1182_p6 = scmp.ne.s32.totalorder %s1631_s3, %s1181_s29  ;;  %p1188_p3 = scmp.lt.u32.totalorder %s1181_s29, %s1631_s3 }
  0x30   : > { %p1184_p9 = pnand %p1182_p6, %p1444_p0 }
  0x32   : > { %p1185_p2 = pneg %p1184_p9 }
  0x34   : > { %p1190_p4 = pnand %p1188_p3, %p1185_p2 }
  0x36   : > { %1193 = shalt.err (!%p1190_p4)
}
  0x37   : > { %s1194_s23 = scalar_lea.vmem %s1432_s26, 1024  ;;  %p1202_p13 = scmp.lt.s32.totalorder %s1432_s26, %s1432_s26 }
  0x38   : > { %p1195_p7 = scmp.ne.s32.totalorder %s1432_s26, %s1194_s23  ;;  %p1203_p1 = scmp.lt.s32.totalorder %s1194_s23, %s1194_s23 }
  0x3a   : > { %p1197_p8 = pnand %p1195_p7, %p1444_p0  ;;  %p1204_p6 = por %p1203_p1, %p1202_p13 }
  0x3c   : > { %p1198_p11 = pneg %p1197_p8 }
  0x3e   : > { %p1205_p9 = pnand %p1204_p6, %p1198_p11 }
  0x40   : > { %1208 = shalt.err (!%p1205_p9)
}
  0x41   : > { %1064 = dma.hbm_to_vmem [thread:$0]  (!%p1428_p12), %s1631_s3, 1024, %s1432_s26, [#allocation3], %s1312_s14, %s1312_s14, %s1313_s16  }
  0x42   : > { %s1209_s17 = scalar_lea.hbm %s1635_s7, 1024 }
  0x43   : > { %p1210_p2 = scmp.ne.s32.totalorder %s1635_s7, %s1209_s17  ;;  %p1216_p7 = scmp.lt.u32.totalorder %s1209_s17, %s1635_s7 }
  0x45   : > { %p1212_p3 = pnand %p1210_p2, %p1444_p0 }
  0x47   : > { %p1213_p4 = pneg %p1212_p3 }
  0x49   : > { %p1218_p8 = pnand %p1216_p7, %p1213_p4 }
  0x4b   : > { %1221 = shalt.err (!%p1218_p8)
}
  0x4c   : > { %s1222_s23 = scalar_lea.vmem %s300_s28, 1024  ;;  %p1230_p6 = scmp.lt.s32.totalorder %s300_s28, %s300_s28 }
  0x4d   : > { %p1223_p11 = scmp.ne.s32.totalorder %s300_s28, %s1222_s23  ;;  %p1231_p9 = scmp.lt.s32.totalorder %s1222_s23, %s1222_s23 }
  0x4f   : > { %p1225_p13 = pnand %p1223_p11, %p1444_p0  ;;  %p1232_p5 = por %p1231_p9, %p1230_p6 }
  0x51   : > { %p1226_p1 = pneg %p1225_p13 }
  0x53   : > { %p1233_p10 = pnand %p1232_p5, %p1226_p1 }
  0x55   : > { %1236 = shalt.err (!%p1233_p10)
}
  0x56   : > { %1070 = dma.hbm_to_vmem [thread:$0]  (!%p1428_p12), %s1635_s7, 1024, %s300_s28, [#allocation6], %s1312_s14, %s1312_s14, %s1313_s16  }
  0x57   : > { %p1656_p2 = scmp.ne.s32.totalorder %s1653_s21, 0 }
  0x58   : > { %p1657_p0 = scmp.eq.s32.totalorder (!%p1656_p2), %s1390_s13, 0 }
  0x59   : > { %327 = sbr.rel (%p1656_p2) target bundleno = 1009 (0x3f1), region = 56 }
  0x60   : > { %1282 = dma.done.wait (%p1657_p0), [#allocation3], 1024   ;;  %p1658_p3 = pmov %p1657_p0 }
  0x61   : > { %p1659_p5 = pmov %p1657_p0 }
  0x62   : > { %1284 = vsyncadd (%p1658_p3), [#allocation3], 4294966272 }
  0x63   : > { %1286 = dma.done.wait (%p1659_p5), [#allocation6], 2048   ;;  %p1660_p10 = pmov %p1657_p0 }
  0x64   : > { %s913_s18 = sshll.u32 %s1390_s13, 1  ;;  %v1314_v0 = vmov 0.0   ;;  %vm1315_vm0 = vmmov 0   ;;  %v1123_v1 = vld [vmem:[%s1629_s1] sm:$0xff]   ;;  %vm401_vm1 = vcmask 130048   ;;  %v1125_v3 = vld [vmem:[#allocation2] sm:$0xff]  }
  0x65   : > { %1288 = vsyncadd (%p1660_p10), [#allocation6], 4294965248  ;;  %981 = vmatprep.subr.bf16.mxu0 %v1314_v0  ;;  %983 = vmatprep.mubr.msk.bf16.mxu0 %vm1315_vm0, %v1314_v0  ;;  %p372_p12 = scmp.lt.s32.totalorder %s913_s18, 3  ;;  %v1126_v4 = vld [vmem:[#allocation2 + $0x8] sm:$0xff]   ;;  %v1127_v5 = vld [vmem:[#allocation2 + $0x10] sm:$0xff]   ;;  %s368_s26 = sand.u32 1, %s1299_s10  }
  0x66   : > { %987 = vmatprep.subr.bf16.mxu1 %v1314_v0  ;;  %1003 = vmatprep.mubr.msk.bf16.mxu1 %vm1315_vm0, %v1314_v0  ;;  %v1128_v6 = vld [vmem:[#allocation2 + $0x18] sm:$0xff]   ;;  %v1129_v7 = vld [vmem:[#allocation2 + $0x20] sm:$0xff]   ;;  %v1130_v8 = vld [vmem:[#allocation2 + $0x28] sm:$0xff]   ;;  %s912_s30 = sshll.u32 %s368_s26, 4  ;;  %s1587_s11 = scalar_lea.sflag [#allocation4], %s368_s26 }
  0x67   : > { %s1671_s18 = smov (!%p372_p12, %s913_s18), 3  ;;  %982 = vmatpush3.bf16.msra.mxu0 %v1123_v1  ;;  %988 = vmatpush3.bf16.msra.mxu1 %v1125_v3  ;;  %v1131_v9 = vld [vmem:[#allocation2 + $0x30] sm:$0xff]   ;;  %v1132_v10 = vld [vmem:[#allocation2 + $0x38] sm:$0xff]   ;;  %v1133_v11 = vld [vmem:[#allocation5] sm:$0xff]   ;;  %p1661_p7 = scmp.ne.s32.totalorder %s1650_s19, 0 }
  0x68   : > { %s914_s21 = sshll.u32 %s1671_s18, 2  ;;  %1007 = vmatprep.subr.bf16.mxu0 %v1314_v0  ;;  %989 = vmatprep.subr.bf16.mxu1 %v1314_v0  ;;  %v1134_v12 = vld [vmem:[#allocation5 + $0x8] sm:$0xff]   ;;  %v1135_v13 = vld [vmem:[#allocation5 + $0x10] sm:$0xff]   ;;  %v1136_v14 = vld [vmem:[#allocation5 + $0x18] sm:$0xff]   ;;  %s951_s18 = sshll.u32 %s1390_s13, 8 }
  0x69   : > { %s375_s14 = scalar_lea.vmem %s1628_s0, %s914_s21  ;;  %v1137_v15 = vld [vmem:[#allocation5 + $0x20] sm:$0xff]   ;;  %v1138_v16 = vld [vmem:[#allocation5 + $0x28] sm:$0xff]   ;;  %v915_v17 = vld [vmem:[%s1630_s2] ss:$0 sm:$0xff]  ;;  %s370_s21 = scalar_lea.vmem [#allocation8], %s912_s30 }
  0x6a   : > { %v1124_v2 = vld [vmem:[%s375_s14] sm:$0xff]   ;;  %v1140_v28 = vld [vmem:[#allocation5 + $0x38] sm:$0xff]   ;;  %v1141_v29 = vld [vmem:[#allocation7] sm:$0xff]   ;;  %s809_s24 = sshll.u32 %s370_s21, 4  ;;  %s1583_s16 = scalar_lea.hbm %s1637_s9, %s951_s18  ;;  %s1585_s24 = int_to_ptr.vmem [resolvable:$true] %s809_s24 }
  0x6b   : > { %984 = vmatmul.mubr.msk.bf16.vlgmr.msra.gmra.mrb[0].mxu0 %vm401_vm1, %v1124_v2  ;;  %990 = vmatpush3.bf16.msra.mxu1 %v1126_v4  ;;  %v1139_v27 = vld [vmem:[#allocation5 + $0x30] sm:$0xff]   ;;  %v1142_v30 = vld [vmem:[#allocation7 + $0x8] sm:$0xff]   ;;  %v1144_v32 = vld [vmem:[#allocation7 + $0x18] sm:$0xff]   ;;  %s1237_s15 = scalar_lea.vmem %s1585_s24, 256  ;;  %s1316_s13 = smov [#allocation8]  }
  0x6c   : > { %1023 = vmatprep.mubr.msk.bf16.mxu0 %vm1315_vm0, %v1314_v0  ;;  %991 = vmatprep.subr.bf16.mxu1 %v1314_v0  ;;  %v1143_v31 = vld [vmem:[#allocation7 + $0x10] sm:$0xff]   ;;  %v1145_v33 = vld [vmem:[#allocation7 + $0x20] sm:$0xff]   ;;  %v1146_v34 = vld [vmem:[#allocation7 + $0x28] sm:$0xff]   ;;  %p1238_p4 = scmp.ne.s32.totalorder %s1585_s24, %s1237_s15  ;;  %s1241_s20 = sshll.u32 %s1316_s13, 4  ;;  %s1242_s20 = int_to_ptr.vmem [resolvable:$false] %s1241_s20 }
  0x6d   : > { %1008 = vmatpush3.bf16.msra.mxu0 %v1133_v11  ;;  %v919_v35 = vld [vmem:[%s1632_s4] ss:$0 sm:$0xff]  ;;  %v1148_v46 = vld [vmem:[#allocation7 + $0x38] sm:$0xff]   ;;  %s1243_s17 = scalar_lea.vmem %s1242_s20, 512  ;;  %p1244_p13 = scmp.lt.s32.totalorder %s1585_s24, %s1242_s20 }
  0x6e   : > { %1009 = vmatprep.subr.bf16.mxu0 %v1314_v0  ;;  %v1147_v45 = vld [vmem:[#allocation7 + $0x30] sm:$0xff]   ;;  %p1239_p8 = pnand %p1238_p4, %p1661_p7  ;;  %p1245_p1 = scmp.lt.s32.totalorder %s1243_s17, %s1237_s15 }
  0x6f   : > { %992 = vmatpush3.bf16.msra.mxu1 %v1127_v5  ;;  %v928_v47 = vld [vmem:[%s1634_s6] ss:$0 sm:$0xff] }
  0x70   : > { %993 = vmatprep.subr.bf16.mxu1 %v1314_v0  ;;  %v937_v57 = vld [vmem:[%s1636_s8] ss:$0 sm:$0xff]  ;;  %p1240_p11 = pneg %p1239_p8  ;;  %p1246_p6 = por %p1245_p1, %p1244_p13 }
  0x71   : > { %1010 = vmatpush3.bf16.msra.mxu0 %v1134_v12 }
  0x72   : > { %1011 = vmatprep.subr.bf16.mxu0 %v1314_v0  ;;  %p1247_p9 = pnand %p1246_p6, %p1240_p11 }
  0x73   : > { %994 = vmatpush3.bf16.msra.mxu1 %v1128_v6 }
  0x74   : > { %995 = vmatprep.subr.bf16.mxu1 %v1314_v0 }
  0x75   : > { %1012 = vmatpush3.bf16.msra.mxu0 %v1135_v13 }
  0x76   : > { %1013 = vmatprep.subr.bf16.mxu0 %v1314_v0 }
  0x77   : > { %996 = vmatpush3.bf16.msra.mxu1 %v1129_v7 }
  0x78   : > { %997 = vmatprep.subr.bf16.mxu1 %v1314_v0 }
  0x79   : > { %1014 = vmatpush3.bf16.msra.mxu0 %v1136_v14 }
  0x7a   : > { %1015 = vmatprep.subr.bf16.mxu0 %v1314_v0 }
  0x7b   : > { %998 = vmatpush3.bf16.msra.mxu1 %v1130_v8 }
  0x7c   : > { %999 = vmatprep.subr.bf16.mxu1 %v1314_v0 }
  0x7d   : > { %1016 = vmatpush3.bf16.msra.mxu0 %v1137_v15 }
  0x7e   : > { %1017 = vmatprep.subr.bf16.mxu0 %v1314_v0 }
  0x7f   : > { %1000 = vmatpush3.bf16.msra.mxu1 %v1131_v9 }
  0x80   : > { %1001 = vmatprep.subr.bf16.mxu1 %v1314_v0 }
  0x81   : > { %1018 = vmatpush3.bf16.msra.mxu0 %v1138_v16 }
  0x82   : > { %1019 = vmatprep.subr.bf16.mxu0 %v1314_v0 }
  0x83   : > { %1002 = vmatpush3.bf16.msra.mxu1 %v1132_v10 }
  0x84   : > { %1027 = vmatprep.subr.bf16.mxu1 %v1314_v0 }
  0x85   : > { %1020 = vmatpush3.bf16.msra.mxu0 %v1139_v27 }
  0x86   : > { %1021 = vmatprep.subr.bf16.mxu0 %v1314_v0 }
  0x89   : > { %1022 = vmatpush3.bf16.msra.mxu0 %v1140_v28 }
 0x13e   : > { %v439_v18 = vpop.f32.mrb[0].mxu0 }
 0x13f   : > { %v440_v19 = vadd.f32 %v915_v17, %v439_v18  ;;  %v985_v20 = vpop.f32.mrb[1].mxu0 }
 0x140   : > { %v442_v21 = vpop.f32.mrb[2].mxu0 }
 0x141   : > { %v443_v22 = vadd.f32 %v915_v17, %v442_v21  ;;  %v986_v23 = vpop.f32.mrb[3].mxu0  ;;  %v446_v24 = vmax.f32 %v440_v19, 0.0 }
 0x143   : > { %v447_v25 = vmax.f32 %v443_v22, 0.0 }
 0x145   : > { %v448_v26 = vpack.c.bf16 %v447_v25, %v446_v24 }
 0x147   : > { %1004 = vmatmul.mubr.bf16.vlgmr.msra.gmra.mrb[0].mxu1 %v448_v26 }
 0x148   : > { %1043 = vmatprep.mubr.msk.bf16.mxu1 %vm1315_vm0, %v1314_v0  ;;  %1028 = vmatpush3.bf16.msra.mxu1 %v1141_v29 }
 0x149   : > { %1029 = vmatprep.subr.bf16.mxu1 %v1314_v0 }
 0x14c   : > { %1030 = vmatpush3.bf16.msra.mxu1 %v1142_v30 }
 0x14d   : > { %1031 = vmatprep.subr.bf16.mxu1 %v1314_v0 }
 0x150   : > { %1032 = vmatpush3.bf16.msra.mxu1 %v1143_v31 }
 0x151   : > { %1033 = vmatprep.subr.bf16.mxu1 %v1314_v0 }
 0x154   : > { %1034 = vmatpush3.bf16.msra.mxu1 %v1144_v32 }
 0x155   : > { %1035 = vmatprep.subr.bf16.mxu1 %v1314_v0 }
 0x158   : > { %1036 = vmatpush3.bf16.msra.mxu1 %v1145_v33 }
 0x159   : > { %1037 = vmatprep.subr.bf16.mxu1 %v1314_v0 }
 0x15c   : > { %1038 = vmatpush3.bf16.msra.mxu1 %v1146_v34 }
 0x15d   : > { %1039 = vmatprep.subr.bf16.mxu1 %v1314_v0 }
 0x160   : > { %1040 = vmatpush3.bf16.msra.mxu1 %v1147_v45 }
 0x161   : > { %1041 = vmatprep.subr.bf16.mxu1 %v1314_v0 }
 0x164   : > { %1042 = vmatpush3.bf16.msra.mxu1 %v1148_v46 }
 0x21a   : > { %v554_v36 = vpop.f32.mrb[0].mxu1 }
 0x21b   : > { %v555_v37 = vadd.f32 %v919_v35, %v554_v36  ;;  %v1005_v38 = vpop.f32.mrb[1].mxu1 }
 0x21c   : > { %v557_v39 = vpop.f32.mrb[2].mxu1 }
 0x21d   : > { %v558_v40 = vadd.f32 %v919_v35, %v557_v39  ;;  %v1006_v41 = vpop.f32.mrb[3].mxu1  ;;  %v561_v42 = vmax.f32 %v555_v37, 0.0 }
 0x21f   : > { %v562_v43 = vmax.f32 %v558_v40, 0.0 }
 0x221   : > { %v563_v44 = vpack.c.bf16 %v562_v43, %v561_v42 }
 0x223   : > { %1024 = vmatmul.mubr.bf16.vlgmr.msra.gmra.mrb[4].mxu0 %v563_v44 }
 0x2f6   : > { %v669_v48 = vpop.f32.mrb[4].mxu0 }
 0x2f7   : > { %v670_v49 = vadd.f32 %v928_v47, %v669_v48  ;;  %v1025_v50 = vpop.f32.mrb[5].mxu0 }
 0x2f8   : > { %v672_v51 = vpop.f32.mrb[6].mxu0 }
 0x2f9   : > { %v673_v52 = vadd.f32 %v928_v47, %v672_v51  ;;  %v1026_v53 = vpop.f32.mrb[7].mxu0  ;;  %v676_v54 = vmax.f32 %v670_v49, 0.0 }
 0x2fb   : > { %v677_v55 = vmax.f32 %v673_v52, 0.0 }
 0x2fd   : > { %v678_v56 = vpack.c.bf16 %v677_v55, %v676_v54 }
 0x2ff   : > { %1044 = vmatmul.mubr.bf16.vlgmr.msra.gmra.mrb[4].mxu1 %v678_v56 }
 0x3d2   : > { %v784_v58 = vpop.f32.mrb[4].mxu1 }
 0x3d3   : > { %v785_v59 = vadd.f32 %v937_v57, %v784_v58  ;;  %v1045_v60 = vpop.f32.mrb[5].mxu1 }
 0x3d4   : > { %v787_v61 = vpop.f32.mrb[6].mxu1 }
 0x3d5   : > { %1149 = vtanh.f32 %v785_v59  ;;  %v788_v62 = vadd.f32 %v937_v57, %v787_v61  ;;  %v1046_v63 = vpop.f32.mrb[7].mxu1 }
 0x3d7   : > { %1151 = vtanh.f32 %v788_v62 }
 0x3df   : > { %v1150_v0 = vpop.eup %1149 }
 0x3e0   : > { %793 = vst [vmem:[%s370_s21] sm:$0xff] %v1150_v0 }
 0x3e1   : > { %v1152_v1 = vpop.eup %1151 }
 0x3e2   : > { %794 = vst [vmem:[%s370_s21 + $0x8] sm:$0xff] %v1152_v1 }
 0x3e3   : > { %1250 = shalt.err (!%p1247_p9)
}
 0x3e4   : > { %s1251_s22 = scalar_lea.hbm %s1583_s16, 256  ;;  %s1255_s29 = scalar_lea.hbm %s1637_s9, 512 }
 0x3e5   : > { %p1252_p2 = scmp.ne.s32.totalorder %s1583_s16, %s1251_s22  ;;  %p1256_p5 = scmp.lt.u32.totalorder %s1583_s16, %s1637_s9 }
 0x3e6   : > { %p1257_p10 = scmp.lt.u32.totalorder %s1255_s29, %s1251_s22  ;;  %p1259_p4 = scmp.lt.u32.totalorder %s1251_s22, %s1583_s16 }
 0x3e7   : > { %p1253_p0 = pnand %p1252_p2, %p1661_p7 }
 0x3e8   : > { %p1258_p12 = por %p1257_p10, %p1256_p5 }
 0x3e9   : > { %p1254_p3 = pneg %p1253_p0 }
 0x3ea   : > { %p1260_p8 = por %p1259_p4, %p1258_p12 }
 0x3ec   : > { %p1261_p11 = pnand %p1260_p8, %p1254_p3 }
 0x3ee   : > { %1264 = shalt.err (!%p1261_p11)
}
 0x3ef   : > { %s1317_s30 = smov 128   ;;  %s1318_s18 = smov 8  }
 0x3f0   : > { %1059 = dma.vmem_to_hbm [thread:$0]  (%p1661_p7), %s1585_s24, 256, %s1583_s16, %s1587_s11, %s1317_s30, %s1317_s30, %s1318_s18  }
 0x3f1 PF: > { %s1662_s21 = sld [smem:[#allocation12_spill]]  ;;  %s1663_s28 = sld [smem:[#allocation16_spill]] }
 0x3f2   : > { %p1081_p13 = scmp.ge.s32.totalorder %s1307_s12, 2 }
 0x3f7   : > { %s824_s14 = sand.u32 1, %s1662_s21   ;;  %p1664_p1 = scmp.ne.s32.totalorder %s1663_s28, 0 }
 0x3f8   : > { %s825_s15 = scalar_lea.sflag [#allocation4], %s824_s14 }
 0x3f9   : > { %p1072_p6 = pnand %p1081_p13, %p1664_p1 }
 0x3fb   : > { %1290 = dma.done.wait (!%p1072_p6), %s825_s15, 256  }
 0x3fc   : > { %1292 = vsyncadd (!%p1072_p6), %s825_s15, 4294967040  ;;  %s1665_s12 = sld [smem:[#allocation14_spill]]  ;;  %s1666_s13 = sld [smem:[#allocation13_spill]] }
 0x3fd   : > { %s1667_s11 = sld [smem:[#allocation15_spill]]  ;;  %s1668_s30 = smov %s1299_s10 }
 0x402   : > { %p21_p9 = scmp.ge.s32.totalorder %s1665_s12, 4   ;;  %s1669_s10 = smov %s1666_s13 }
 0x404   :  { %23 = sbr.rel (!%p21_p9) target bundleno = 5 (0x5), region = 104 }
 0x40b   :  { %830 = vsyncpa [#allocation3], 1 }
 0x40c   :  { %832 = vsyncpa [#allocation3 + $0x1], 1 }
 0x40d   :  { %833 = vsyncpa [#allocation6], 1 }
 0x40e   :  { %834 = vsyncpa [#allocation4], 1 }
 0x40f   :  { %836 = vsyncpa [#allocation4 + $0x1], 1 }

</bundles_post_ra>
